<compile_context>
chip_gen: v6e
topology: v6e:2x2x1
jax: 0.10.0
libtpu: 0.0.40
codegen_flags: <defaults>
</compile_context>

<pallas_src>
import functools

import jax
import jax.numpy as jnp
import numpy as np
from jax.experimental import pallas as pl
from jax.experimental.pallas import tpu as pltpu


# ------------------------------- fused kernel --------------------------------

def _fused_bottleneck_kernel(x_ref, w1_ref, b1_ref, w2_ref, b2_ref, w3_ref,
                             b3_ref, o_ref, hp_ref, *,
                             tile_h, n_row_tiles, depthwise, compute_dtype):
    """One grid step = one (batch image, output-row tile) of the whole block.

    x_ref : (H, W, Cin)        full input image (VMEM-resident across row tiles)
    w1_ref: (Cin, Cmid)        conv1 weights, BN1 scale folded in
    w2_ref: (3,3,1,Cmid)            depthwise taps (D == 1), or
            (3,3,n_chunks,chunk,chunk) diagonal-chunk block-diag taps (D > 1)
    w3_ref: (Cmid, C4)         conv3 weights, BN3 scale folded in
    b*_ref: (1, C)             BN shifts
    o_ref : (TH, W, C4)        output row tile
    hp_ref: (TH+2, W+2, Cmid)  zero-ring-padded conv1 output tile (VMEM scratch)
    """
    i = pl.program_id(1)
    TH = tile_h
    _, W, Cin = x_ref.shape
    Cmid = hp_ref.shape[-1]
    C4 = o_ref.shape[-1]
    cdt = compute_dtype
    hdt = hp_ref.dtype

    r0 = i * TH
    if TH % 8 == 0:                      # aligned sublane loads at real widths
        r0 = pl.multiple_of(r0, TH)

    w1 = w1_ref[...]
    b1 = b1_ref[...]

    def conv1_rows(rows3d):                     # (R, W, Cin) -> (R, W, Cmid)
        R = rows3d.shape[0]
        h = jnp.dot(rows3d.reshape(R * W, Cin).astype(cdt), w1,
                    preferred_element_type=jnp.float32)
        return jnp.maximum(h + b1, 0.0).reshape(R, W, Cmid).astype(hdt)

    # ---- stage 1: conv1x1 + BN1 + ReLU into the zero-ring-padded scratch ----
    # Only the pad columns are zeroed per step; the pad rows are zeroed only at
    # the image edges (pl.when below).  Interior + halo rows are overwritten.
    zcol = jnp.zeros((TH + 2, 1, Cmid), hdt)
    hp_ref[:, 0:1, :] = zcol
    hp_ref[:, W + 1:W + 2, :] = zcol

    x_tile = x_ref[pl.ds(r0, TH)]                                 # (TH, W, Cin)
    hp_ref[1:TH + 1, 1:W + 1, :] = conv1_rows(x_tile)

    zrow = jnp.zeros((1, W, Cmid), hdt)

    @pl.when(i == 0)
    def _():                                     # top pad row (image boundary)
        hp_ref[0:1, 1:W + 1, :] = zrow

    @pl.when(i > 0)
    def _():                                     # top halo row (cheap recompute)
        hp_ref[0:1, 1:W + 1, :] = conv1_rows(x_ref[pl.ds(r0 - 1, 1)])

    @pl.when(i == n_row_tiles - 1)
    def _():                                     # bottom pad row
        hp_ref[TH + 1:TH + 2, 1:W + 1, :] = zrow

    @pl.when(i < n_row_tiles - 1)
    def _():                                     # bottom halo row
        hp_ref[TH + 1:TH + 2, 1:W + 1, :] = conv1_rows(x_ref[pl.ds(r0 + TH, 1)])

    # ---- stage 2 + 3: grouped 3x3 conv, conv1x1, residual, ReLU --------------
    res = x_tile.reshape(TH * W, C4).astype(jnp.float32)  # Cin == C4 (identity)

    # TODO(synk): the per-tap hp slices+reshapes materialize VMEM copies; a
    # pltpu.roll-based W-shift (XLU slot) would make them ~free at real widths.
    if depthwise:
        # D == 1: per-channel conv -> 9 VPU multiply-accumulates (no MXU waste).
        acc = jnp.zeros((TH, W, Cmid), jnp.float32)
        for ky in range(3):
            for kx in range(3):
                acc = acc + hp_ref[ky:ky + TH, kx:kx + W, :] * w2_ref[ky, kx]
        h2 = jnp.maximum(acc + b2_ref[...], 0.0).reshape(TH * W, Cmid)
        y = jnp.dot(h2.astype(cdt), w3_ref[...],
                    preferred_element_type=jnp.float32)
    else:
        # Diagonal-chunk block-diagonal grouped conv: only the (chunk x chunk)
        # diagonal matmuls are issued; conv3 is applied per chunk and summed.
        n_chunks, chunk = w2_ref.shape[2], w2_ref.shape[3]
        y = jnp.zeros((TH * W, C4), jnp.float32)
        for c in range(n_chunks):
            c0 = c * chunk
            acc = jnp.zeros((TH * W, chunk), jnp.float32)
            for ky in range(3):
                for kx in range(3):
                    patch = hp_ref[ky:ky + TH, kx:kx + W, c0:c0 + chunk]
                    acc = acc + jnp.dot(patch.reshape(TH * W, chunk),
                                        w2_ref[ky, kx, c],
                                        preferred_element_type=jnp.float32)
            h2c = jnp.maximum(acc + b2_ref[:, c0:c0 + chunk], 0.0)
            y = y + jnp.dot(h2c.astype(cdt), w3_ref[c0:c0 + chunk, :],
                            preferred_element_type=jnp.float32)

    y = y + b3_ref[...] + res
    o_ref[...] = jnp.maximum(y, 0.0).reshape(TH, W, C4).astype(o_ref.dtype)


# ------------------------------- wrapper glue ---------------------------------

def _bn_fold(gamma, beta, mean, var, eps=1e-5):
    scale = gamma / jnp.sqrt(var + eps)
    shift = beta - mean * scale
    return scale, shift


def _pick_chunk(Cmid, D, cardinality, target=128):
    """Channel-chunk size for the block-diag grouped conv: multiple of D,
    divisor of Cmid, smallest such >= target lanes (else Cmid)."""
    if Cmid <= target:
        return Cmid
    best = Cmid
    for g in range(1, cardinality + 1):
        if cardinality % g == 0:
            c = D * g
            if target <= c < best:
                best = c
    return best


def _block_diag_chunked(w2, groups, chunk):
    """Grouped-conv weight (Cmid, D, 3, 3) -> (3,3,n_chunks,chunk,chunk): only
    the diagonal chunks of the block-diagonal expansion are materialized."""
    Cmid, D, _, _ = w2.shape
    assert Cmid % groups == 0 and D == Cmid // groups
    assert chunk % D == 0 and Cmid % chunk == 0
    n_chunks = Cmid // chunk
    gpc = chunk // D                               # groups per chunk
    w2_np = np.asarray(w2, np.float32)
    bd = np.zeros((3, 3, n_chunks, chunk, chunk), np.float32)
    for c in range(n_chunks):
        for gl in range(gpc):
            g = c * gpc + gl
            blk = np.transpose(w2_np[g * D:(g + 1) * D], (2, 3, 1, 0))  # (3,3,Din,Dout)
            bd[:, :, c, gl * D:(gl + 1) * D, gl * D:(gl + 1) * D] = blk
    return jnp.asarray(bd)


def _vmem_capacity_bytes():
    try:
        return int(pltpu.get_tpu_info().vmem_capacity_bytes)
    except Exception:
        return 128 << 20            # conservative v5e/v6e default


def _pick_tile_h(H, W, Cmid, C4, hp_itemsize, budget_bytes):
    divisors = [d for d in range(1, H + 1) if H % d == 0]

    def tile_bytes(th):
        return ((th + 2) * (W + 2) * Cmid * hp_itemsize      # hp scratch
                + 2 * th * W * C4 * 4)                       # double-buffered out
    fitting = [th for th in divisors if tile_bytes(th) <= budget_bytes]
    if not fitting:
        return divisors[0]
    # Prefer sublane-aligned tiles whose matmul M-dim (TH*W) is >= 256.
    pref = [th for th in fitting if th % 8 == 0 and th * W >= 256]
    return (pref or fitting)[-1]


def resnext_bottleneck_forward(x_nchw, params, *, stride=1, cardinality=32,
                               tile_h=None, compute_dtype=jnp.float32):
    """Fused forward of the ResNeXt bottleneck block (downsample=None config)."""
    N, Cin, H, W = x_nchw.shape
    if stride != 1:
        # TODO(synk): stride>1 / the optional self.downsample branch is not
        # implemented (the downsample=None config requires stride == 1).
        raise NotImplementedError("downsample=None config requires stride == 1")

    w1 = params["w1"][:, :, 0, 0]            # (Cmid, Cin)
    w3 = params["w3"][:, :, 0, 0]            # (C4, Cmid)
    w2 = params["w2"]                        # (Cmid, D, 3, 3)
    Cmid, D = int(w2.shape[0]), int(w2.shape[1])
    C4 = int(w3.shape[0])
    assert Cin == C4, "identity residual requires in_channels == out_channels*expansion"
    depthwise = (D == 1)

    s1, b1 = _bn_fold(*params["bn1"])
    s2, b2 = _bn_fold(*params["bn2"])
    s3, b3 = _bn_fold(*params["bn3"])

    # Fold BN scales into conv weights; only the per-channel shift survives.
    w1f = (w1 * s1[:, None]).T.astype(compute_dtype)            # (Cin, Cmid)
    w3f = (w3 * s3[:, None]).T.astype(compute_dtype)            # (Cmid, C4)
    if depthwise:
        # (Cmid,1,3,3) -> (3,3,1,Cmid); kept f32 (VPU path, also v5e-safe).
        w2f = (jnp.transpose(w2[:, 0], (1, 2, 0)) * s2)[:, :, None, :]
        w2f = w2f.astype(jnp.float32)
    else:
        chunk = _pick_chunk(Cmid, D, cardinality)
        n_chunks = Cmid // chunk
        w2f = (_block_diag_chunked(w2, cardinality, chunk)
               * s2.reshape(1, 1, n_chunks, 1, chunk)).astype(compute_dtype)

    b1 = b1.reshape(1, Cmid).astype(jnp.float32)
    b2 = b2.reshape(1, Cmid).astype(jnp.float32)
    b3 = b3.reshape(1, C4).astype(jnp.float32)

    hp_dtype = jnp.float32 if depthwise else compute_dtype
    hp_bytes = jnp.dtype(hp_dtype).itemsize

    vmem_cap = _vmem_capacity_bytes()
    vmem_usable = int(vmem_cap * 0.85)   # headroom for Mosaic internal scratch

    if tile_h is None:
        tile_h = _pick_tile_h(H, W, Cmid, C4, hp_bytes,
                              budget_bytes=min(8 << 20, vmem_usable // 4))
    assert H % tile_h == 0
    nH = H // tile_h

    # Activations travel in compute_dtype (bf16 halves HBM traffic + full-image
    # VMEM residency); the residual is upcast to f32 inside the kernel.
    # TODO(synk): at network scale keep activations NHWC end-to-end instead of
    # transposing NCHW<->NHWC at every block boundary.
    x_nhwc = jnp.transpose(x_nchw, (0, 2, 3, 1)).astype(compute_dtype)
    act_bytes = jnp.dtype(compute_dtype).itemsize

    kernel = functools.partial(
        _fused_bottleneck_kernel, tile_h=tile_h, n_row_tiles=nH,
        depthwise=depthwise, compute_dtype=compute_dtype)

    w_bytes = jnp.dtype(compute_dtype).itemsize
    w2_total = int(np.prod(w2f.shape)) * w2f.dtype.itemsize
    block_bytes = (H * W * Cin * act_bytes                       # full image
                   + tile_h * W * C4 * 4                         # out block
                   + (tile_h + 2) * (W + 2) * Cmid * hp_bytes    # hp scratch
                   + (Cin * Cmid + Cmid * C4) * w_bytes          # w1, w3
                   + w2_total)                                   # w2 chunks
    vmem_limit = int(min(vmem_usable, max(32 << 20, 2 * block_bytes + (8 << 20))))

    w2_zero = (0,) * w2f.ndim

    out_nhwc = pl.pallas_call(
        kernel,
        out_shape=jax.ShapeDtypeStruct((N, H, W, C4), jnp.float32),
        grid=(N, nH),
        in_specs=[
            # Full image per batch element; block index depends only on n, so
            # it is DMA'd once per image and stays VMEM-resident across row tiles.
            pl.BlockSpec((None, H, W, Cin), lambda n, i: (n, 0, 0, 0)),
            # TODO(synk): single-buffer the constant-index weight/bias blocks
            # (pipeline_mode=pl.Buffered(1)) to save VMEM on v7x at real widths.
            pl.BlockSpec((Cin, Cmid), lambda n, i: (0, 0)),
            pl.BlockSpec((1, Cmid), lambda n, i: (0, 0)),
            pl.BlockSpec(w2f.shape, lambda n, i: w2_zero),
            pl.BlockSpec((1, Cmid), lambda n, i: (0, 0)),
            pl.BlockSpec((Cmid, C4), lambda n, i: (0, 0)),
            pl.BlockSpec((1, C4), lambda n, i: (0, 0)),
        ],
        out_specs=pl.BlockSpec((None, tile_h, W, C4), lambda n, i: (n, i, 0, 0)),
        scratch_shapes=[pltpu.VMEM((tile_h + 2, W + 2, Cmid), hp_dtype)],
        compiler_params=pltpu.CompilerParams(
            # Batch axis megacore-parallel; row axis sequential so the full
            # image is not duplicated in both TensorCores' VMEM on v7x.
            dimension_semantics=("parallel", "arbitrary"),
            vmem_limit_bytes=vmem_limit),
    )(x_nhwc, w1f, b1, w2f, b2, w3f, b3)

    return jnp.transpose(out_nhwc, (0, 3, 1, 2))   # NHWC -> NCHW


# ----------------------------- pure-JAX reference ----------------------------

def _ref_forward(x, params, *, stride, cardinality, eps=1e-5):
    def conv(x, w, stride=1, pad=0, groups=1):
        return jax.lax.conv_general_dilated(
            x, w, (stride, stride), [(pad, pad), (pad, pad)],
            dimension_numbers=("NCHW", "OIHW", "NCHW"),
            feature_group_count=groups)

    def bn(x, p):
        g, b, m, v = (a.reshape(1, -1, 1, 1) for a in p)
        return g * (x - m) / jnp.sqrt(v + eps) + b

    out = jax.nn.relu(bn(conv(x, params["w1"]), params["bn1"]))
    out = jax.nn.relu(bn(conv(out, params["w2"], stride, 1, cardinality), params["bn2"]))
    out = bn(conv(out, params["w3"]), params["bn3"])
    return jax.nn.relu(out + x)


# ------------------------------------ main ------------------------------------

if __name__ == "__main__":
    def bn_params(k, C):
        k1, k2, k3, k4 = jax.random.split(k, 4)
        gamma = 1.0 + 0.1 * jax.random.normal(k1, (C,), jnp.float32)
        beta = 0.1 * jax.random.normal(k2, (C,), jnp.float32)
        mean = 0.1 * jax.random.normal(k3, (C,), jnp.float32)
        var = 0.9 + 0.2 * jax.random.uniform(k4, (C,), jnp.float32)
        return (gamma, beta, mean, var)

    def run_case(key, *, out_channels, cardinality, base_width, N, H, W,
                 tile_h, compute_dtype, rtol, atol):
        D = int(out_channels * (base_width / 64))
        Cmid = D * cardinality
        C4 = out_channels * 4
        Cin = C4                    # downsample=None -> identity residual works
        ks = jax.random.split(key, 8)
        x = jax.random.normal(ks[0], (N, Cin, H, W), jnp.float32)
        params = {
            "w1": 0.1 * jax.random.normal(ks[1], (Cmid, Cin, 1, 1), jnp.float32),
            "w2": 0.1 * jax.random.normal(ks[2], (Cmid, D, 3, 3), jnp.float32),
            "w3": 0.1 * jax.random.normal(ks[3], (C4, Cmid, 1, 1), jnp.float32),
            "bn1": bn_params(ks[4], Cmid),
            "bn2": bn_params(ks[5], Cmid),
            "bn3": bn_params(ks[6], C4),
        }
        out = jax.block_until_ready(resnext_bottleneck_forward(
            x, params, stride=1, cardinality=cardinality,
            tile_h=tile_h, compute_dtype=compute_dtype))
        ref = jax.block_until_ready(
            _ref_forward(x, params, stride=1, cardinality=cardinality))
        np.testing.assert_allclose(np.asarray(out), np.asarray(ref),
                                   rtol=rtol, atol=atol)

    keys = jax.random.split(jax.random.PRNGKey(0), 5)

    # 1) Module's small config: out_channels=8, cardinality=32, base_width=8
    #    -> D=1 (depthwise VPU path), Cmid=C4=Cin=32.  f32, 2 row tiles.
    run_case(keys[0], out_channels=8, cardinality=32, base_width=8,
             N=2, H=8, W=8, tile_h=4, compute_dtype=jnp.float32,
             rtol=1e-3, atol=1e-3)

    # 2) Same config with bf16 activation stream + bf16 matmul operands
    #    (f32 accumulate + f32 epilogue).
    run_case(keys[1], out_channels=8, cardinality=32, base_width=8,
             N=2, H=8, W=8, tile_h=4, compute_dtype=jnp.bfloat16,
             rtol=5e-2, atol=5e-2)

    # 3) D>1, single-chunk block-diag MXU path (Cmid=64 <= 128), f32, tight.
    run_case(keys[2], out_channels=16, cardinality=8, base_width=32,
             N=2, H=8, W=8, tile_h=2, compute_dtype=jnp.float32,
             rtol=1e-3, atol=1e-3)

    # 4) Multi-chunk block-diag path: Cmid=256 -> 2 x 128-lane diagonal chunks,
    #    f32, tight check of the chunked grouped-conv construction.
    run_case(keys[3], out_channels=64, cardinality=32, base_width=8,
             N=1, H=8, W=8, tile_h=4, compute_dtype=jnp.float32,
             rtol=1e-3, atol=1e-3)

    # 5) Same multi-chunk config end-to-end bf16 (bf16 hp scratch, bf16
    #    activation stream) compared against the f32 reference -> loose tol.
    run_case(keys[4], out_channels=64, cardinality=32, base_width=8,
             N=1, H=8, W=8, tile_h=4, compute_dtype=jnp.bfloat16,
             rtol=1e-1, atol=2e-1)

    print("KERNEL_OK")
</pallas_src>

<mosaic_0001>
module attributes {stable_mosaic.version = 11 : i64} {
  func.func @_fused_bottleneck_kernel(%arg0: i32, %arg1: i32, %arg2: memref<1x8x8x32xf32, #tpu.memory_space<vmem>>, %arg3: memref<32x32xf32, #tpu.memory_space<vmem>>, %arg4: memref<1x32xf32, #tpu.memory_space<vmem>>, %arg5: memref<3x3x1x32xf32, #tpu.memory_space<vmem>>, %arg6: memref<1x32xf32, #tpu.memory_space<vmem>>, %arg7: memref<32x32xf32, #tpu.memory_space<vmem>>, %arg8: memref<1x32xf32, #tpu.memory_space<vmem>>, %arg9: memref<1x4x8x32xf32, #tpu.memory_space<vmem>>, %arg10: memref<6x10x32xf32, #tpu.memory_space<vmem>>) attributes {dimension_semantics = [#tpu.dimension_semantics<parallel>, #tpu.dimension_semantics<arbitrary>], iteration_bounds = array<i64: 2, 2>, scalar_prefetch = 0 : i64, scratch_operands = 1 : i64, tpu.core_type = #tpu.core_type<tc>, window_params = [{transform_indices = @transform_0, window_bounds = array<i64: 1, 8, 8, 32>}, {pipeline_mode = #tpu.pipeline_mode<synchronous>, transform_indices = @transform_1, window_bounds = array<i64: 32, 32>}, {pipeline_mode = #tpu.pipeline_mode<synchronous>, transform_indices = @transform_2, window_bounds = array<i64: 1, 32>}, {pipeline_mode = #tpu.pipeline_mode<synchronous>, transform_indices = @transform_3, window_bounds = array<i64: 3, 3, 1, 32>}, {pipeline_mode = #tpu.pipeline_mode<synchronous>, transform_indices = @transform_4, window_bounds = array<i64: 1, 32>}, {pipeline_mode = #tpu.pipeline_mode<synchronous>, transform_indices = @transform_5, window_bounds = array<i64: 32, 32>}, {pipeline_mode = #tpu.pipeline_mode<synchronous>, transform_indices = @transform_6, window_bounds = array<i64: 1, 32>}, {transform_indices = @transform_7, window_bounds = array<i64: 1, 4, 8, 32>}]} {
    %c4_i32 = arith.constant 4 : i32
    %0 = arith.muli %arg1, %c4_i32 : i32
    %c0 = arith.constant 0 : index
    %c0_0 = arith.constant 0 : index
    %1 = vector.load %arg3[%c0, %c0_0] : memref<32x32xf32, #tpu.memory_space<vmem>>, vector<32x32xf32>
    %c0_1 = arith.constant 0 : index
    %c0_2 = arith.constant 0 : index
    %2 = vector.load %arg4[%c0_1, %c0_2] : memref<1x32xf32, #tpu.memory_space<vmem>>, vector<1x32xf32>
    %cst = arith.constant 0.000000e+00 : f32
    %3 = vector.broadcast %cst : f32 to vector<6x1x32xf32>
    %c0_3 = arith.constant 0 : index
    %c0_4 = arith.constant 0 : index
    %c0_5 = arith.constant 0 : index
    %4 = vector.load %arg10[%c0_3, %c0_4, %c0_5] : memref<6x10x32xf32, #tpu.memory_space<vmem>>, vector<6x1x32xf32>
    tpu.vector_store %arg10[%c0_3, %c0_4, %c0_5], %3 {strides = array<i32>} : memref<6x10x32xf32, #tpu.memory_space<vmem>>, vector<6x1x32xf32>,
    %c0_6 = arith.constant 0 : index
    %c9 = arith.constant 9 : index
    %c0_7 = arith.constant 0 : index
    %5 = vector.load %arg10[%c0_6, %c9, %c0_7] : memref<6x10x32xf32, #tpu.memory_space<vmem>>, vector<6x1x32xf32>
    tpu.vector_store %arg10[%c0_6, %c9, %c0_7], %3 {strides = array<i32>} : memref<6x10x32xf32, #tpu.memory_space<vmem>>, vector<6x1x32xf32>,
    %c0_8 = arith.constant 0 : index
    %6 = arith.index_cast %0 : i32 to index
    %c0_9 = arith.constant 0 : index
    %c0_10 = arith.constant 0 : index
    %7 = vector.load %arg2[%c0_8, %6, %c0_9, %c0_10] : memref<1x8x8x32xf32, #tpu.memory_space<vmem>>, vector<1x4x8x32xf32>
    %8 = vector.shape_cast %7 : vector<1x4x8x32xf32> to vector<4x8x32xf32>
    %9 = vector.shape_cast %8 : vector<4x8x32xf32> to vector<32x32xf32>
    %cst_11 = arith.constant dense<0.000000e+00> : vector<32x32xf32>
    %10 = tpu.matmul %9, %1, %cst_11 {dimension_numbers = #tpu.dot_dimension_numbers<[1], [0], [0], [1], [0, 0, 1, 1], [], []>} : vector<32x32xf32>, vector<32x32xf32>, vector<32x32xf32> -> vector<32x32xf32>
    %11 = vector.broadcast %2 : vector<1x32xf32> to vector<32x32xf32>
    %12 = arith.addf %10, %11 : vector<32x32xf32>
    %cst_12 = arith.constant 0.000000e+00 : f32
    %13 = vector.broadcast %cst_12 : f32 to vector<32x32xf32>
    %14 = arith.maximumf %12, %13 : vector<32x32xf32>
    %15 = vector.shape_cast %14 : vector<32x32xf32> to vector<4x8x32xf32>
    %c1 = arith.constant 1 : index
    %c1_13 = arith.constant 1 : index
    %c0_14 = arith.constant 0 : index
    %16 = vector.load %arg10[%c1, %c1_13, %c0_14] : memref<6x10x32xf32, #tpu.memory_space<vmem>>, vector<4x8x32xf32>
    tpu.vector_store %arg10[%c1, %c1_13, %c0_14], %15 {strides = array<i32>} : memref<6x10x32xf32, #tpu.memory_space<vmem>>, vector<4x8x32xf32>,
    %cst_15 = arith.constant 0.000000e+00 : f32
    %17 = vector.broadcast %cst_15 : f32 to vector<1x8x32xf32>
    %c0_i32 = arith.constant 0 : i32
    %18 = arith.cmpi eq, %arg1, %c0_i32 : i32
    %19 = arith.extui %18 : i1 to i32
    %c0_i32_16 = arith.constant 0 : i32
    %20 = arith.cmpi ne, %19, %c0_i32_16 : i32
    scf.if %20 {
      %c0_98 = arith.constant 0 : index
      %c1_99 = arith.constant 1 : index
      %c0_100 = arith.constant 0 : index
      %114 = vector.load %arg10[%c0_98, %c1_99, %c0_100] : memref<6x10x32xf32, #tpu.memory_space<vmem>>, vector<1x8x32xf32>
      tpu.vector_store %arg10[%c0_98, %c1_99, %c0_100], %17 {strides = array<i32>} : memref<6x10x32xf32, #tpu.memory_space<vmem>>, vector<1x8x32xf32>,
    } else {
    }
    %c0_i32_17 = arith.constant 0 : i32
    %21 = arith.cmpi sgt, %arg1, %c0_i32_17 : i32
    %22 = arith.extui %21 : i1 to i32
    %c0_i32_18 = arith.constant 0 : i32
    %23 = arith.cmpi ne, %22, %c0_i32_18 : i32
    scf.if %23 {
      %c1_i32_98 = arith.constant 1 : i32
      %114 = arith.subi %0, %c1_i32_98 : i32
      %c0_99 = arith.constant 0 : index
      %115 = arith.index_cast %114 : i32 to index
      %c0_100 = arith.constant 0 : index
      %c0_101 = arith.constant 0 : index
      %116 = vector.load %arg2[%c0_99, %115, %c0_100, %c0_101] : memref<1x8x8x32xf32, #tpu.memory_space<vmem>>, vector<1x1x8x32xf32>
      %117 = vector.shape_cast %116 : vector<1x1x8x32xf32> to vector<1x8x32xf32>
      %118 = vector.shape_cast %117 : vector<1x8x32xf32> to vector<8x32xf32>
      %cst_102 = arith.constant dense<0.000000e+00> : vector<8x32xf32>
      %119 = tpu.matmul %118, %1, %cst_102 {dimension_numbers = #tpu.dot_dimension_numbers<[1], [0], [0], [1], [0, 0, 1, 1], [], []>} : vector<8x32xf32>, vector<32x32xf32>, vector<8x32xf32> -> vector<8x32xf32>
      %120 = vector.broadcast %2 : vector<1x32xf32> to vector<8x32xf32>
      %121 = arith.addf %119, %120 : vector<8x32xf32>
      %cst_103 = arith.constant 0.000000e+00 : f32
      %122 = vector.broadcast %cst_103 : f32 to vector<8x32xf32>
      %123 = arith.maximumf %121, %122 : vector<8x32xf32>
      %124 = vector.shape_cast %123 : vector<8x32xf32> to vector<1x8x32xf32>
      %c0_104 = arith.constant 0 : index
      %c1_105 = arith.constant 1 : index
      %c0_106 = arith.constant 0 : index
      %125 = vector.load %arg10[%c0_104, %c1_105, %c0_106] : memref<6x10x32xf32, #tpu.memory_space<vmem>>, vector<1x8x32xf32>
      tpu.vector_store %arg10[%c0_104, %c1_105, %c0_106], %124 {strides = array<i32>} : memref<6x10x32xf32, #tpu.memory_space<vmem>>, vector<1x8x32xf32>,
    } else {
    }
    %c1_i32 = arith.constant 1 : i32
    %24 = arith.cmpi eq, %arg1, %c1_i32 : i32
    %25 = arith.extui %24 : i1 to i32
    %c0_i32_19 = arith.constant 0 : i32
    %26 = arith.cmpi ne, %25, %c0_i32_19 : i32
    scf.if %26 {
      %c5 = arith.constant 5 : index
      %c1_98 = arith.constant 1 : index
      %c0_99 = arith.constant 0 : index
      %114 = vector.load %arg10[%c5, %c1_98, %c0_99] : memref<6x10x32xf32, #tpu.memory_space<vmem>>, vector<1x8x32xf32>
      tpu.vector_store %arg10[%c5, %c1_98, %c0_99], %17 {strides = array<i32>} : memref<6x10x32xf32, #tpu.memory_space<vmem>>, vector<1x8x32xf32>,
    } else {
    }
    %c1_i32_20 = arith.constant 1 : i32
    %27 = arith.cmpi slt, %arg1, %c1_i32_20 : i32
    %28 = arith.extui %27 : i1 to i32
    %c0_i32_21 = arith.constant 0 : i32
    %29 = arith.cmpi ne, %28, %c0_i32_21 : i32
    scf.if %29 {
      %c4_i32_98 = arith.constant 4 : i32
      %114 = arith.addi %0, %c4_i32_98 : i32
      %c0_99 = arith.constant 0 : index
      %115 = arith.index_cast %114 : i32 to index
      %c0_100 = arith.constant 0 : index
      %c0_101 = arith.constant 0 : index
      %116 = vector.load %arg2[%c0_99, %115, %c0_100, %c0_101] : memref<1x8x8x32xf32, #tpu.memory_space<vmem>>, vector<1x1x8x32xf32>
      %117 = vector.shape_cast %116 : vector<1x1x8x32xf32> to vector<1x8x32xf32>
      %118 = vector.shape_cast %117 : vector<1x8x32xf32> to vector<8x32xf32>
      %cst_102 = arith.constant dense<0.000000e+00> : vector<8x32xf32>
      %119 = tpu.matmul %118, %1, %cst_102 {dimension_numbers = #tpu.dot_dimension_numbers<[1], [0], [0], [1], [0, 0, 1, 1], [], []>} : vector<8x32xf32>, vector<32x32xf32>, vector<8x32xf32> -> vector<8x32xf32>
      %120 = vector.broadcast %2 : vector<1x32xf32> to vector<8x32xf32>
      %121 = arith.addf %119, %120 : vector<8x32xf32>
      %cst_103 = arith.constant 0.000000e+00 : f32
      %122 = vector.broadcast %cst_103 : f32 to vector<8x32xf32>
      %123 = arith.maximumf %121, %122 : vector<8x32xf32>
      %124 = vector.shape_cast %123 : vector<8x32xf32> to vector<1x8x32xf32>
      %c5 = arith.constant 5 : index
      %c1_104 = arith.constant 1 : index
      %c0_105 = arith.constant 0 : index
      %125 = vector.load %arg10[%c5, %c1_104, %c0_105] : memref<6x10x32xf32, #tpu.memory_space<vmem>>, vector<1x8x32xf32>
      tpu.vector_store %arg10[%c5, %c1_104, %c0_105], %124 {strides = array<i32>} : memref<6x10x32xf32, #tpu.memory_space<vmem>>, vector<1x8x32xf32>,
    } else {
    }
    %30 = vector.shape_cast %8 : vector<4x8x32xf32> to vector<32x32xf32>
    %cst_22 = arith.constant 0.000000e+00 : f32
    %31 = vector.broadcast %cst_22 : f32 to vector<4x8x32xf32>
    %c0_23 = arith.constant 0 : index
    %c0_24 = arith.constant 0 : index
    %c0_25 = arith.constant 0 : index
    %32 = vector.load %arg10[%c0_23, %c0_24, %c0_25] : memref<6x10x32xf32, #tpu.memory_space<vmem>>, vector<4x8x32xf32>
    %c0_26 = arith.constant 0 : index
    %c0_27 = arith.constant 0 : index
    %c0_28 = arith.constant 0 : index
    %c0_29 = arith.constant 0 : index
    %33 = vector.load %arg5[%c0_26, %c0_27, %c0_28, %c0_29] : memref<3x3x1x32xf32, #tpu.memory_space<vmem>>, vector<1x1x1x32xf32>
    %34 = vector.shape_cast %33 : vector<1x1x1x32xf32> to vector<1x32xf32>
    %35 = vector.shape_cast %34 : vector<1x32xf32> to vector<1x1x32xf32>
    %36 = vector.broadcast %35 : vector<1x1x32xf32> to vector<4x8x32xf32>
    %37 = arith.mulf %32, %36 : vector<4x8x32xf32>
    %38 = arith.addf %31, %37 : vector<4x8x32xf32>
    %c0_30 = arith.constant 0 : index
    %c1_31 = arith.constant 1 : index
    %c0_32 = arith.constant 0 : index
    %39 = vector.load %arg10[%c0_30, %c1_31, %c0_32] : memref<6x10x32xf32, #tpu.memory_space<vmem>>, vector<4x8x32xf32>
    %c0_33 = arith.constant 0 : index
    %c1_34 = arith.constant 1 : index
    %c0_35 = arith.constant 0 : index
    %c0_36 = arith.constant 0 : index
    %40 = vector.load %arg5[%c0_33, %c1_34, %c0_35, %c0_36] : memref<3x3x1x32xf32, #tpu.memory_space<vmem>>, vector<1x1x1x32xf32>
    %41 = vector.shape_cast %40 : vector<1x1x1x32xf32> to vector<1x32xf32>
    %42 = vector.shape_cast %41 : vector<1x32xf32> to vector<1x1x32xf32>
    %43 = vector.broadcast %42 : vector<1x1x32xf32> to vector<4x8x32xf32>
    %44 = arith.mulf %39, %43 : vector<4x8x32xf32>
    %45 = arith.addf %38, %44 : vector<4x8x32xf32>
    %c0_37 = arith.constant 0 : index
    %c2 = arith.constant 2 : index
    %c0_38 = arith.constant 0 : index
    %46 = vector.load %arg10[%c0_37, %c2, %c0_38] : memref<6x10x32xf32, #tpu.memory_space<vmem>>, vector<4x8x32xf32>
    %c0_39 = arith.constant 0 : index
    %c2_40 = arith.constant 2 : index
    %c0_41 = arith.constant 0 : index
    %c0_42 = arith.constant 0 : index
    %47 = vector.load %arg5[%c0_39, %c2_40, %c0_41, %c0_42] : memref<3x3x1x32xf32, #tpu.memory_space<vmem>>, vector<1x1x1x32xf32>
    %48 = vector.shape_cast %47 : vector<1x1x1x32xf32> to vector<1x32xf32>
    %49 = vector.shape_cast %48 : vector<1x32xf32> to vector<1x1x32xf32>
    %50 = vector.broadcast %49 : vector<1x1x32xf32> to vector<4x8x32xf32>
    %51 = arith.mulf %46, %50 : vector<4x8x32xf32>
    %52 = arith.addf %45, %51 : vector<4x8x32xf32>
    %c1_43 = arith.constant 1 : index
    %c0_44 = arith.constant 0 : index
    %c0_45 = arith.constant 0 : index
    %53 = vector.load %arg10[%c1_43, %c0_44, %c0_45] : memref<6x10x32xf32, #tpu.memory_space<vmem>>, vector<4x8x32xf32>
    %c1_46 = arith.constant 1 : index
    %c0_47 = arith.constant 0 : index
    %c0_48 = arith.constant 0 : index
    %c0_49 = arith.constant 0 : index
    %54 = vector.load %arg5[%c1_46, %c0_47, %c0_48, %c0_49] : memref<3x3x1x32xf32, #tpu.memory_space<vmem>>, vector<1x1x1x32xf32>
    %55 = vector.shape_cast %54 : vector<1x1x1x32xf32> to vector<1x32xf32>
    %56 = vector.shape_cast %55 : vector<1x32xf32> to vector<1x1x32xf32>
    %57 = vector.broadcast %56 : vector<1x1x32xf32> to vector<4x8x32xf32>
    %58 = arith.mulf %53, %57 : vector<4x8x32xf32>
    %59 = arith.addf %52, %58 : vector<4x8x32xf32>
    %c1_50 = arith.constant 1 : index
    %c1_51 = arith.constant 1 : index
    %c0_52 = arith.constant 0 : index
    %60 = vector.load %arg10[%c1_50, %c1_51, %c0_52] : memref<6x10x32xf32, #tpu.memory_space<vmem>>, vector<4x8x32xf32>
    %c1_53 = arith.constant 1 : index
    %c1_54 = arith.constant 1 : index
    %c0_55 = arith.constant 0 : index
    %c0_56 = arith.constant 0 : index
    %61 = vector.load %arg5[%c1_53, %c1_54, %c0_55, %c0_56] : memref<3x3x1x32xf32, #tpu.memory_space<vmem>>, vector<1x1x1x32xf32>
    %62 = vector.shape_cast %61 : vector<1x1x1x32xf32> to vector<1x32xf32>
    %63 = vector.shape_cast %62 : vector<1x32xf32> to vector<1x1x32xf32>
    %64 = vector.broadcast %63 : vector<1x1x32xf32> to vector<4x8x32xf32>
    %65 = arith.mulf %60, %64 : vector<4x8x32xf32>
    %66 = arith.addf %59, %65 : vector<4x8x32xf32>
    %c1_57 = arith.constant 1 : index
    %c2_58 = arith.constant 2 : index
    %c0_59 = arith.constant 0 : index
    %67 = vector.load %arg10[%c1_57, %c2_58, %c0_59] : memref<6x10x32xf32, #tpu.memory_space<vmem>>, vector<4x8x32xf32>
    %c1_60 = arith.constant 1 : index
    %c2_61 = arith.constant 2 : index
    %c0_62 = arith.constant 0 : index
    %c0_63 = arith.constant 0 : index
    %68 = vector.load %arg5[%c1_60, %c2_61, %c0_62, %c0_63] : memref<3x3x1x32xf32, #tpu.memory_space<vmem>>, vector<1x1x1x32xf32>
    %69 = vector.shape_cast %68 : vector<1x1x1x32xf32> to vector<1x32xf32>
    %70 = vector.shape_cast %69 : vector<1x32xf32> to vector<1x1x32xf32>
    %71 = vector.broadcast %70 : vector<1x1x32xf32> to vector<4x8x32xf32>
    %72 = arith.mulf %67, %71 : vector<4x8x32xf32>
    %73 = arith.addf %66, %72 : vector<4x8x32xf32>
    %c2_64 = arith.constant 2 : index
    %c0_65 = arith.constant 0 : index
    %c0_66 = arith.constant 0 : index
    %74 = vector.load %arg10[%c2_64, %c0_65, %c0_66] : memref<6x10x32xf32, #tpu.memory_space<vmem>>, vector<4x8x32xf32>
    %c2_67 = arith.constant 2 : index
    %c0_68 = arith.constant 0 : index
    %c0_69 = arith.constant 0 : index
    %c0_70 = arith.constant 0 : index
    %75 = vector.load %arg5[%c2_67, %c0_68, %c0_69, %c0_70] : memref<3x3x1x32xf32, #tpu.memory_space<vmem>>, vector<1x1x1x32xf32>
    %76 = vector.shape_cast %75 : vector<1x1x1x32xf32> to vector<1x32xf32>
    %77 = vector.shape_cast %76 : vector<1x32xf32> to vector<1x1x32xf32>
    %78 = vector.broadcast %77 : vector<1x1x32xf32> to vector<4x8x32xf32>
    %79 = arith.mulf %74, %78 : vector<4x8x32xf32>
    %80 = arith.addf %73, %79 : vector<4x8x32xf32>
    %c2_71 = arith.constant 2 : index
    %c1_72 = arith.constant 1 : index
    %c0_73 = arith.constant 0 : index
    %81 = vector.load %arg10[%c2_71, %c1_72, %c0_73] : memref<6x10x32xf32, #tpu.memory_space<vmem>>, vector<4x8x32xf32>
    %c2_74 = arith.constant 2 : index
    %c1_75 = arith.constant 1 : index
    %c0_76 = arith.constant 0 : index
    %c0_77 = arith.constant 0 : index
    %82 = vector.load %arg5[%c2_74, %c1_75, %c0_76, %c0_77] : memref<3x3x1x32xf32, #tpu.memory_space<vmem>>, vector<1x1x1x32xf32>
    %83 = vector.shape_cast %82 : vector<1x1x1x32xf32> to vector<1x32xf32>
    %84 = vector.shape_cast %83 : vector<1x32xf32> to vector<1x1x32xf32>
    %85 = vector.broadcast %84 : vector<1x1x32xf32> to vector<4x8x32xf32>
    %86 = arith.mulf %81, %85 : vector<4x8x32xf32>
    %87 = arith.addf %80, %86 : vector<4x8x32xf32>
    %c2_78 = arith.constant 2 : index
    %c2_79 = arith.constant 2 : index
    %c0_80 = arith.constant 0 : index
    %88 = vector.load %arg10[%c2_78, %c2_79, %c0_80] : memref<6x10x32xf32, #tpu.memory_space<vmem>>, vector<4x8x32xf32>
    %c2_81 = arith.constant 2 : index
    %c2_82 = arith.constant 2 : index
    %c0_83 = arith.constant 0 : index
    %c0_84 = arith.constant 0 : index
    %89 = vector.load %arg5[%c2_81, %c2_82, %c0_83, %c0_84] : memref<3x3x1x32xf32, #tpu.memory_space<vmem>>, vector<1x1x1x32xf32>
    %90 = vector.shape_cast %89 : vector<1x1x1x32xf32> to vector<1x32xf32>
    %91 = vector.shape_cast %90 : vector<1x32xf32> to vector<1x1x32xf32>
    %92 = vector.broadcast %91 : vector<1x1x32xf32> to vector<4x8x32xf32>
    %93 = arith.mulf %88, %92 : vector<4x8x32xf32>
    %94 = arith.addf %87, %93 : vector<4x8x32xf32>
    %c0_85 = arith.constant 0 : index
    %c0_86 = arith.constant 0 : index
    %95 = vector.load %arg6[%c0_85, %c0_86] : memref<1x32xf32, #tpu.memory_space<vmem>>, vector<1x32xf32>
    %96 = vector.shape_cast %95 : vector<1x32xf32> to vector<1x1x32xf32>
    %97 = vector.broadcast %96 : vector<1x1x32xf32> to vector<4x8x32xf32>
    %98 = arith.addf %94, %97 : vector<4x8x32xf32>
    %cst_87 = arith.constant 0.000000e+00 : f32
    %99 = vector.broadcast %cst_87 : f32 to vector<4x8x32xf32>
    %100 = arith.maximumf %98, %99 : vector<4x8x32xf32>
    %101 = vector.shape_cast %100 : vector<4x8x32xf32> to vector<32x32xf32>
    %c0_88 = arith.constant 0 : index
    %c0_89 = arith.constant 0 : index
    %102 = vector.load %arg7[%c0_88, %c0_89] : memref<32x32xf32, #tpu.memory_space<vmem>>, vector<32x32xf32>
    %cst_90 = arith.constant dense<0.000000e+00> : vector<32x32xf32>
    %103 = tpu.matmul %101, %102, %cst_90 {dimension_numbers = #tpu.dot_dimension_numbers<[1], [0], [0], [1], [0, 0, 1, 1], [], []>} : vector<32x32xf32>, vector<32x32xf32>, vector<32x32xf32> -> vector<32x32xf32>
    %c0_91 = arith.constant 0 : index
    %c0_92 = arith.constant 0 : index
    %104 = vector.load %arg8[%c0_91, %c0_92] : memref<1x32xf32, #tpu.memory_space<vmem>>, vector<1x32xf32>
    %105 = vector.broadcast %104 : vector<1x32xf32> to vector<32x32xf32>
    %106 = arith.addf %103, %105 : vector<32x32xf32>
    %107 = arith.addf %106, %30 : vector<32x32xf32>
    %cst_93 = arith.constant 0.000000e+00 : f32
    %108 = vector.broadcast %cst_93 : f32 to vector<32x32xf32>
    %109 = arith.maximumf %107, %108 : vector<32x32xf32>
    %110 = vector.shape_cast %109 : vector<32x32xf32> to vector<4x8x32xf32>
    %c0_94 = arith.constant 0 : index
    %c0_95 = arith.constant 0 : index
    %c0_96 = arith.constant 0 : index
    %c0_97 = arith.constant 0 : index
    %111 = vector.load %arg9[%c0_94, %c0_95, %c0_96, %c0_97] : memref<1x4x8x32xf32, #tpu.memory_space<vmem>>, vector<1x4x8x32xf32>
    %112 = vector.shape_cast %111 : vector<1x4x8x32xf32> to vector<4x8x32xf32>
    %113 = vector.shape_cast %110 : vector<4x8x32xf32> to vector<1x4x8x32xf32>
    tpu.vector_store %arg9[%c0_94, %c0_95, %c0_96, %c0_97], %113 {strides = array<i32>} : memref<1x4x8x32xf32, #tpu.memory_space<vmem>>, vector<1x4x8x32xf32>,
    return
  }
  func.func @transform_0(%arg0: i32, %arg1: i32) -> (i32, i32, i32, i32) {
    %c0_i32 = arith.constant 0 : i32
    %c0_i32_0 = arith.constant 0 : i32
    %c0_i32_1 = arith.constant 0 : i32
    %c0_i32_2 = arith.constant 0 : i32
    return %arg0, %c0_i32, %c0_i32_0, %c0_i32_1 : i32, i32, i32, i32
  }
  func.func @transform_1(%arg0: i32, %arg1: i32) -> (i32, i32) {
    %c0_i32 = arith.constant 0 : i32
    %c0_i32_0 = arith.constant 0 : i32
    %c0_i32_1 = arith.constant 0 : i32
    return %c0_i32, %c0_i32_0 : i32, i32
  }
  func.func @transform_2(%arg0: i32, %arg1: i32) -> (i32, i32) {
    %c0_i32 = arith.constant 0 : i32
    %c0_i32_0 = arith.constant 0 : i32
    %c0_i32_1 = arith.constant 0 : i32
    return %c0_i32, %c0_i32_0 : i32, i32
  }
  func.func @transform_3(%arg0: i32, %arg1: i32) -> (i32, i32, i32, i32) {
    %c0_i32 = arith.constant 0 : i32
    %c0_i32_0 = arith.constant 0 : i32
    %c0_i32_1 = arith.constant 0 : i32
    %c0_i32_2 = arith.constant 0 : i32
    %c0_i32_3 = arith.constant 0 : i32
    return %c0_i32, %c0_i32_0, %c0_i32_1, %c0_i32_2 : i32, i32, i32, i32
  }
  func.func @transform_4(%arg0: i32, %arg1: i32) -> (i32, i32) {
    %c0_i32 = arith.constant 0 : i32
    %c0_i32_0 = arith.constant 0 : i32
    %c0_i32_1 = arith.constant 0 : i32
    return %c0_i32, %c0_i32_0 : i32, i32
  }
  func.func @transform_5(%arg0: i32, %arg1: i32) -> (i32, i32) {
    %c0_i32 = arith.constant 0 : i32
    %c0_i32_0 = arith.constant 0 : i32
    %c0_i32_1 = arith.constant 0 : i32
    return %c0_i32, %c0_i32_0 : i32, i32
  }
  func.func @transform_6(%arg0: i32, %arg1: i32) -> (i32, i32) {
    %c0_i32 = arith.constant 0 : i32
    %c0_i32_0 = arith.constant 0 : i32
    %c0_i32_1 = arith.constant 0 : i32
    return %c0_i32, %c0_i32_0 : i32, i32
  }
  func.func @transform_7(%arg0: i32, %arg1: i32) -> (i32, i32, i32, i32) {
    %c0_i32 = arith.constant 0 : i32
    %c0_i32_0 = arith.constant 0 : i32
    %c0_i32_1 = arith.constant 0 : i32
    return %arg0, %arg1, %c0_i32, %c0_i32_0 : i32, i32, i32, i32
  }
}

</mosaic_0001>

<bundles_post_ra>
// kernel: tpu_custom_call.1
= control target key start
LH: loop header
LB: loop body
LE: loop exit
PB: predicated region body
PF: predicated region fallthrough
CT: control target
= control target key end

     0   :  { %s2149_s0 = inlined_call_operand.hbm [shape: f32[2,8,8,32], index: 0, kind: input, shape index: {}]   ;;  %s2150_s1 = inlined_call_operand.hbm [shape: f32[32,32], index: 1, kind: input, shape index: {}]   ;;  %s2151_s2 = inlined_call_operand.vmem [shape: f32[1,32], index: 2, kind: input, shape index: {}]   ;;  %s2152_s3 = inlined_call_operand.hbm [shape: f32[3,3,1,32], index: 3, kind: input, shape index: {}]   ;;  %s2153_s4 = inlined_call_operand.vmem [shape: f32[1,32], index: 4, kind: input, shape index: {}]   ;;  %s2154_s5 = inlined_call_operand.hbm [shape: f32[32,32], index: 5, kind: input, shape index: {}]   ;;  %s2155_s6 = inlined_call_operand.vmem [shape: f32[1,32], index: 6, kind: input, shape index: {}]   ;;  %s2156_s7 = inlined_call_operand.hbm [shape: f32[2,8,8,32], index: 7, kind: output, shape index: {}]  }
   0x1   :  { %2170 = sst [smem:[#allocation23_spill]] %s2150_s1 }
   0x2   :  { %2171 = sst [smem:[#allocation24_spill]] %s2152_s3 }
   0x3   :  { %2172 = sst [smem:[#allocation25_spill]] %s2153_s4 }
   0x4   :  { %2173 = sst [smem:[#allocation26_spill]] %s2154_s5 }
   0x5   :  { %2174 = sst [smem:[#allocation27_spill]] %s2155_s6 }
   0x6   :  { %2175 = sst [smem:[#allocation28_spill]] %s2156_s7 }
   0x7   :  { %12 = vsyncpa [#allocation4], 0 }
   0x8   :  { %14 = vsyncpa [#allocation4 + $0x1], 0 }
   0x9   :  { %15 = vsyncpa [#allocation7], 0 }
   0xa   :  { %16 = vsyncpa [#allocation10], 0 }
   0xb   :  { %17 = vsyncpa [#allocation5], 0 }
   0xc   :  { %19 = vsyncpa [#allocation5 + $0x1], 0  ;;  %s1717_s24 = smov 0   ;;  %s1719_s25 = smov 0  }
   0xd   :  { %s1721_s26 = smov 0   ;;  %s1723_s27 = smov 0  }
   0xe   :  { %s1725_s28 = smov 0   ;;  %s1727_s29 = smov 0  }
   0xf   :  { %s1729_s30 = smov 0   ;;  %s1731_s8 = smov 0  }
  0x10   :  { %s1733_s9 = smov 0   ;;  %s1735_s10 = smov 0  }
  0x11   :  { %s1737_s11 = smov 0  }
  0x12 LB: > { %2176 = sst [smem:[#allocation16_spill]] %s1617_s24  ;;  %s1127_s12 = sadd.s32 4294967295, %s1657_s11   ;;  %s1657_s11 = sphi %s1737_s11, %s25_s11   ;;  %s1653_s10 = sphi %s1735_s10, %s2216_s10   ;;  %s1649_s9 = sphi %s1733_s9, %s2207_s9   ;;  %s1645_s8 = sphi %s1731_s8, %s2215_s8   ;;  %s1641_s30 = sphi %s1729_s30, %s2206_s30   ;;  %s1637_s29 = sphi %s1727_s29, %s2214_s29   ;;  %s1633_s28 = sphi %s1725_s28, %s2213_s28   ;;  %s1629_s27 = sphi %s1723_s27, %s2212_s27   ;;  %s1625_s26 = sphi %s1721_s26, %s2211_s26   ;;  %s1621_s25 = sphi %s1719_s25, %s2210_s25   ;;  %s1617_s24 = sphi %s1717_s24, %s2209_s24  }
  0x13   : > { %2177 = sst [smem:[#allocation17_spill]] %s1645_s8  ;;  %s1128_s13 = sadd.s32 4294967294, %s1657_s11  }
  0x14   : > { %2178 = sst [smem:[#allocation18_spill]] %s1649_s9  ;;  %p57_p0 = scmp.ne.s32.totalorder %s1633_s28, %s1629_s27 }
  0x15   : > { %p1773_p1 = scmp.eq.s32.totalorder %s1127_s12, 0  ;;  %p208_p2 = scmp.ne.s32.totalorder %s1625_s26, %s1621_s25 }
  0x16   : > { %p209_p4 = scmp.eq.s32.totalorder %s1127_s12, 3  ;;  %p214_p5 = scmp.ne.s32.totalorder %s1621_s25, %s1617_s24 }
  0x17   : > { %p1782_p3 = por %p1773_p1, %p57_p0  ;;  %p215_p6 = scmp.eq.s32.totalorder %s1128_s13, 3 }
  0x18   : > { %p1788_p7 = por %p209_p4, %p208_p2  ;;  %p1129_p8 = scmp.ge.s32.totalorder %s1657_s11, 1 }
  0x19   : > { %p1793_p9 = por %p215_p6, %p214_p5  ;;  %p222_p10 = scmp.lt.s32.totalorder %s1657_s11, 5 }
  0x1a   : > { %s2181_s17 = scalar_select %p1788_p7, 1, 0 }
  0x1b   : > { %s2183_s18 = scalar_select %p1793_p9, 1, 0 }
  0x1c   : > { %2182 = sst [smem:[#allocation19_spill]] %s2181_s17  ;;  %p1798_p11 = pnand %p1129_p8, %p222_p10 }
  0x1d   : > { %2184 = sst [smem:[#allocation20_spill]] %s2183_s18  ;;  %s1659_s20 = smov [#allocation6]  }
  0x1e   : > { %s234_s21 = sshll.u32 %s1659_s20, 4  ;;  %p1293_p12 = pneg %p1798_p11  ;;  %s235_s21 = int_to_ptr.vmem [resolvable:$true] %s234_s21 }
  0x1f   : > { %s1660_s23 = smov [#allocation8]   ;;  %s1434_s12 = scalar_lea.vmem %s235_s21, 512 }
  0x20   : > { %p1806_p13 = pnand %p1293_p12, %p1773_p1  ;;  %s250_s27 = sshll.u32 %s1660_s23, 4  ;;  %s1810_s27 = int_to_ptr.vmem [resolvable:$true] %s250_s27 }
  0x21   : > { %p1435_p2 = scmp.ne.s32.totalorder %s235_s21, %s1434_s12  ;;  %p1442_p6 = scmp.lt.s32.totalorder %s235_s21, %s235_s21 }
  0x22   : > { %p1425_p0 = pneg %p1806_p13  ;;  %p1443_p8 = scmp.lt.s32.totalorder %s1434_s12, %s1434_s12 }
  0x24   : > { %p1437_p4 = pnand %p1435_p2, %p1425_p0  ;;  %p1444_p10 = por %p1443_p8, %p1442_p6 }
  0x26   : > { %p1438_p5 = pneg %p1437_p4 }
  0x28   : > { %p1445_p12 = pnand %p1444_p10, %p1438_p5 }
  0x2a   : > { %1448 = shalt.err (!%p1445_p12)
}
  0x2b   : > { %s2160_s13 = smov 128   ;;  %s2162_s20 = smov 8  }
  0x2c   : > { %s2187_s1 = sld [smem:[#allocation23_spill]]  ;;  %s1460_s12 = scalar_lea.vmem %s1810_s27, 144 }
  0x2d   : > { %p1461_p2 = scmp.ne.s32.totalorder %s1810_s27, %s1460_s12  ;;  %s1467_s18 = scalar_lea.vmem %s1810_s27, 160 }
  0x2e   : > { %p1468_p6 = scmp.lt.s32.totalorder %s1810_s27, %s1810_s27  ;;  %p1469_p8 = scmp.lt.s32.totalorder %s1467_s18, %s1460_s12 }
  0x2f   : > { %p1463_p4 = pnand %p1461_p2, %p1425_p0 }
  0x30   : > { %p1470_p10 = por %p1469_p8, %p1468_p6 }
  0x31   : > { %p1464_p5 = pneg %p1463_p4 }
  0x32   : > { %1296 = dma.hbm_to_vmem [thread:$0]  (!%p1806_p13), %s2187_s1, 512, %s235_s21, [#allocation7], %s2160_s13, %s2160_s13, %s2162_s20  }
  0x33   : > { %p1471_p12 = pnand %p1470_p10, %p1464_p5 }
  0x35   : > { %1474 = shalt.err (!%p1471_p12)
}
  0x36   : > { %s1663_s24 = smov 16   ;;  %s1664_s7 = smov 1  }
  0x37   : > { %s2188_s3 = sld [smem:[#allocation24_spill]]  ;;  %s1665_s23 = smov [#allocation9]  }
  0x38   : > { %s266_s13 = sshll.u32 %s1665_s23, 4  ;;  %s267_s13 = int_to_ptr.vmem [resolvable:$true] %s266_s13 }
  0x39   : > { %s1486_s20 = scalar_lea.vmem %s267_s13, 512  ;;  %p1494_p6 = scmp.lt.s32.totalorder %s267_s13, %s267_s13 }
  0x3a   : > { %p1487_p2 = scmp.ne.s32.totalorder %s267_s13, %s1486_s20  ;;  %p1495_p8 = scmp.lt.s32.totalorder %s1486_s20, %s1486_s20 }
  0x3c   : > { %p1489_p4 = pnand %p1487_p2, %p1425_p0  ;;  %p1496_p10 = por %p1495_p8, %p1494_p6 }
  0x3d   : > { %1299 = dma.hbm_to_vmem [thread:$0]  (!%p1806_p13), %s2188_s3, 144, %s1810_s27, [#allocation7], %s1663_s24, %s1663_s24, %s1664_s7  }
  0x3e   : > { %p1490_p5 = pneg %p1489_p4 }
  0x40   : > { %p1497_p12 = pnand %p1496_p10, %p1490_p5 }
  0x42   : > { %1500 = shalt.err (!%p1497_p12)
}
  0x43   : > { %s2189_s18 = smov 8   ;;  %s2190_s12 = smov 128  }
  0x44   : > { %s2191_s5 = sld [smem:[#allocation26_spill]]  ;;  %s34_s27 = sadd.s32 1, %s1649_s9 }
  0x45   : > { %p35_p0 = scmp.ge.s32.totalorder %s34_s27, 2  ;;  %s37_s22 = sadd.s32 1, %s1653_s10 }
  0x46   : > { %s44_s20 = sadd.s32 1, %s1637_s29  ;;  %p51_p2 = scmp.ne.s32.totalorder %s1637_s29, %s1633_s28 }
  0x47   : > { %s2218_s27 = smov (%p35_p0, %s34_s27), 0  ;;  %s2220_s22 = smov (!%p35_p0, %s37_s22), %s1653_s10 }
  0x48   : > { %2192 = sst [smem:[#allocation21_spill]] %s2218_s27  ;;  %p52_p4 = scmp.eq.s32.totalorder %s1657_s11, 0 }
  0x49   : > { %s194_s15 = ssub.s32 %s1649_s9, %s2218_s27  ;;  %p39_p5 = scmp.ge.s32.totalorder %s2220_s22, 2 }
  0x4a   : > { %1302 = dma.hbm_to_vmem [thread:$0]  (!%p1806_p13), %s2191_s5, 512, %s267_s13, [#allocation10], %s2190_s12, %s2190_s12, %s2189_s18  }
  0x4b   : > { %p1314_p6 = scmp.lt.s32.totalorder %s1657_s11, 4  ;;  %p1862_p13 = por %p52_p4, %p51_p2 }
  0x4c   : > { %s283_s21 = sand.u32 1, %s1637_s29   ;;  %s2222_s22 = smov (%p39_p5, %s2220_s22), 0 }
  0x4d   : > { %2194 = sst [smem:[#allocation22_spill]] %s2222_s22  ;;  %s1134_s23 = sshll.u32 %s283_s21, 6 }
  0x4e   : > { %s41_s7 = ssub.s32 %s1653_s10, %s2222_s22  ;;  %s1182_s1 = sshll.u32 %s1653_s10, 10 }
  0x4f   : > { %p42_p8 = scmp.eq.s32.totalorder %s41_s7, 0  ;;  %s195_s24 = sor.u32 %s194_s15, %s41_s7 }
  0x50   : > { %p196_p10 = scmp.eq.s32.totalorder %s195_s24, 0  ;;  %s2195_s5 = sadd.s32 1, %s1625_s26 }
  0x51   : > { %s1873_s3 = scalar_select %p42_p8, %s1637_s29, %s44_s20  }
  0x52   : > { %s1878_s27 = scalar_select %p196_p10, %s1625_s26, %s2195_s5  }
  0x53   : > { %s293_s6 = scalar_lea.hbm %s2149_s0, %s1182_s1  ;;  %s287_s8 = scalar_lea.vmem [#allocation3], %s1134_s23 }
  0x54   : > { %s294_s4 = sshll.u32 %s287_s8, 4  ;;  %p1887_p12 = pnand %p1314_p6, %p1862_p13  ;;  %s295_s4 = int_to_ptr.vmem [resolvable:$true] %s294_s4 }
  0x55   : > { %s284_s15 = scalar_lea.sflag [#allocation4], %s283_s21  ;;  %s1514_s20 = scalar_lea.vmem %s295_s4, 1024 }
  0x56   : > { %p1503_p0 = pneg %p1887_p12  ;;  %p1515_p2 = scmp.ne.s32.totalorder %s295_s4, %s1514_s20 }
  0x57   : > { %s1666_s5 = smov [#allocation3]  }
  0x58   : > { %p1517_p4 = pnand %p1515_p2, %p1503_p0  ;;  %s1519_s9 = sshll.u32 %s1666_s5, 4  ;;  %s1520_s9 = int_to_ptr.vmem [resolvable:$false] %s1519_s9 }
  0x59   : > { %s1521_s1 = scalar_lea.vmem %s1520_s9, 2048  ;;  %p1522_p8 = scmp.lt.s32.totalorder %s295_s4, %s1520_s9 }
  0x5a   : > { %p1518_p5 = pneg %p1517_p4  ;;  %p1523_p10 = scmp.lt.s32.totalorder %s1521_s1, %s1514_s20 }
  0x5c   : > { %p1524_p9 = por %p1523_p10, %p1522_p8 }
  0x5e   : > { %p1525_p7 = pnand %p1524_p9, %p1518_p5 }
  0x60   : > { %1528 = shalt.err (!%p1525_p7)
}
  0x61   : > { %1306 = dma.hbm_to_vmem [thread:$0]  (!%p1887_p12), %s293_s6, 1024, %s295_s4, %s284_s15, %s2190_s12, %s2190_s12, %s2189_s18  }
  0x62   : > { %306 = sbr.rel (%p1798_p11) target bundleno = 1007 (0x3ef), region = 48  ;;  %s308_s8 = sand.u32 (!%p1798_p11), 1, %s1633_s28  }
  0x63   : > { %s1901_s17 = sshll.u32 (!%p1798_p11), %s308_s8, 6  ;;  %s309_s13 = scalar_lea.sflag (!%p1798_p11), [#allocation4], %s308_s8 }
  0x64   : > { %s312_s21 = scalar_lea.vmem (!%p1798_p11), [#allocation3], %s1901_s17 }
  0x67   : > { %1600 = dma.done.wait (%p1782_p3), %s309_s13, 1024  }
  0x68   : > { %1602 = vsyncadd (%p1782_p3), %s309_s13, 4294966272 }
  0x69   : > { %1604 = dma.done.wait (%p1773_p1), [#allocation7], 656  }
  0x6a   : > { %1606 = vsyncadd (%p1773_p1), [#allocation7], 4294966640 }
  0x6b   : > { %1608 = dma.done.wait (%p1773_p1), [#allocation10], 512  }
  0x6c   : > { %1610 = vsyncadd (%p1773_p1), [#allocation10], 4294966784  ;;  %vm362_vm0 = vcmask 253952   ;;  %s352_s4 = sand.u32 1, %s1621_s25   ;;  %s1143_s6 = sshll.u32 %s1641_s30, 2  ;;  %v1667_v0 = vmov 0.0  }
  0x6d   : > { %363 = vst.msk [vmem:[#allocation2] sm:$0x1] %vm362_vm0, %v1667_v0  ;;  %364 = vst.msk [vmem:[#allocation2 + $0x10] sm:$0x1] %vm362_vm0, %v1667_v0  ;;  %s1920_s14 = sshll.u32 %s352_s4, 5  ;;  %v1922_v1 = vld [vmem:[#allocation6 + $0x18] sm:$0xff] }
  0x6e   : > { %365 = vst.msk [vmem:[#allocation2 + $0x20] sm:$0x1] %vm362_vm0, %v1667_v0  ;;  %366 = vst.msk [vmem:[#allocation2 + $0x30] sm:$0x1] %vm362_vm0, %v1667_v0  ;;  %v1924_v2 = vld [vmem:[#allocation6 + $0x10] sm:$0xff]  ;;  %s1183_s16 = sshll.u32 %s1641_s30, 5  ;;  %1211 = vmatprep.subr.mxu0 %v1922_v1  ;;  %1261 = vmatprep.subr.mxu1 %v1922_v1 }
  0x6f   : > { %367 = vst.msk [vmem:[#allocation2 + $0x40] sm:$0x1] %vm362_vm0, %v1667_v0  ;;  %368 = vst.msk [vmem:[#allocation2 + $0x50] sm:$0x1] %vm362_vm0, %v1667_v0  ;;  %1212 = vmatpush3.msra.mxu0 %v1922_v1  ;;  %1265 = vmatpush3.msra.mxu1 %v1922_v1  ;;  %v1931_v3 = vld [vmem:[#allocation6 + $0x8] sm:$0xff]  ;;  %s1937_s19 = scalar_lea.vmem %s312_s21, %s1183_s16 [#allocation3]  ;;  %v1941_v4 = vld [vmem:[#allocation6] sm:$0xff] }
  0x70   : > { %369 = vst.msk [vmem:[#allocation2 + $0x9] sm:$0x1] %vm362_vm0, %v1667_v0  ;;  %370 = vst.msk [vmem:[#allocation2 + $0x19] sm:$0x1] %vm362_vm0, %v1667_v0  ;;  %1213 = vmatprep.subr.mxu0 %v1924_v2  ;;  %1262 = vmatprep.subr.mxu1 %v1924_v2  ;;  %v1948_v5 = vld [vmem:[%s1937_s19] sm:$0xff]  ;;  %vm387_vm1 = vcmask 261120  }
  0x71   : > { %371 = vst.msk [vmem:[#allocation2 + $0x29] sm:$0x1] %vm362_vm0, %v1667_v0  ;;  %372 = vst.msk [vmem:[#allocation2 + $0x39] sm:$0x1] %vm362_vm0, %v1667_v0  ;;  %1214 = vmatpush3.msra.mxu0 %v1924_v2  ;;  %1266 = vmatpush3.msra.mxu1 %v1924_v2  ;;  %v1951_v6 = vld [vmem:[%s1937_s19 + $0x10] sm:$0xff]  ;;  %v1956_v7 = vld [vmem:[%s1937_s19 + $0x8] sm:$0xff] }
  0x72   : > { %373 = vst.msk [vmem:[#allocation2 + $0x49] sm:$0x1] %vm362_vm0, %v1667_v0  ;;  %374 = vst.msk [vmem:[#allocation2 + $0x59] sm:$0x1] %vm362_vm0, %v1667_v0  ;;  %1215 = vmatprep.subr.mxu0 %v1931_v3  ;;  %1263 = vmatprep.subr.mxu1 %v1931_v3  ;;  %v1959_v8 = vld [vmem:[%s1937_s19 + $0x18] sm:$0xff]  ;;  %s1985_s22 = scalar_lea.vmem [#allocation11], %s1920_s14 }
  0x73   : > { %1216 = vmatpush3.msra.mxu0 %v1931_v3  ;;  %1267 = vmatpush3.msra.mxu1 %v1931_v3  ;;  %v1974_v9 = vld [vmem:[%s2151_s2] ss:$0 sm:$0xff]  ;;  %p1150_p1 = scmp.ne.s32.totalorder %s1641_s30, 0 }
  0x74   : > { %1217 = vmatprep.subr.mxu0 %v1941_v4  ;;  %1264 = vmatprep.subr.mxu1 %v1941_v4 }
  0x75   : > { %1218 = vmatpush3.msra.mxu0 %v1941_v4  ;;  %1268 = vmatpush3.msra.mxu1 %v1941_v4 }
  0x76   : > { %1219 = vmatprep.mubr.msk.f32.mxu0 %vm387_vm1, %v1948_v5  ;;  %1222 = vmatprep.mubr.msk.f32.mxu1 %vm387_vm1, %v1951_v6 }
  0x77   : > { %1220 = vmatmul.mubr.msk.f32.vlgmr.msra.gmra.mxu0 %vm387_vm1, %v1956_v7  ;;  %1223 = vmatmul.mubr.msk.f32.vlgmr.msra.gmra.mxu1 %vm387_vm1, %v1959_v8 }
 0x137   : > { %v1221_v10 = vpop.f32.mrf.mxu0  ;;  %v1224_v11 = vpop.f32.mrf.mxu1 }
 0x138   : > { %v472_v12 = vadd.f32 %v1221_v10, %v1974_v9  ;;  %v482_v13 = vadd.f32 %v1224_v11, %v1974_v9 }
 0x139   : > { %v466_v14 = vpop.f32.mrf.mxu0  ;;  %v476_v15 = vpop.f32.mrf.mxu1 }
 0x13a   : > { %v486_v16 = vmax.f32 %v472_v12, 0.0  ;;  %v488_v17 = vmax.f32 %v482_v13, 0.0  ;;  %v467_v18 = vadd.f32 %v1974_v9, %v466_v14  ;;  %v477_v19 = vadd.f32 %v1974_v9, %v476_v15  ;;  %497 = sbr.rel (%p1150_p1) target bundleno = 321 (0x141), region = 68 }
 0x13c   : > { %491 = vst.msk [vmem:[#allocation2 + $0x21] sm:$0xff] %vm387_vm1, %v486_v16  ;;  %493 = vst.msk [vmem:[#allocation2 + $0x41] sm:$0xff] %vm387_vm1, %v488_v17  ;;  %v485_v20 = vmax.f32 %v467_v18, 0.0  ;;  %v487_v21 = vmax.f32 %v477_v19, 0.0 }
 0x13e   : > { %490 = vst.msk [vmem:[#allocation2 + $0x11] sm:$0xff] %vm387_vm1, %v485_v20  ;;  %492 = vst.msk [vmem:[#allocation2 + $0x31] sm:$0xff] %vm387_vm1, %v487_v21 }
 0x13f   : > { %v1668_v22 = vmov 0.0  }
 0x140   : > { %498 = vst.msk [vmem:[#allocation2 + $0x1] sm:$0xff] %vm387_vm1, %v1668_v22 }
 0x141 PF: > { %p1151_p3 = scmp.le.s32.totalorder %s1641_s30, 0 }
 0x142   : > { %s1152_s23 = sadd.s32 (!%p1151_p3), 4294967295, %s1143_s6 }
 0x143   : > { %502 = sbr.rel (%p1151_p3) target bundleno = 535 (0x217), region = 72  ;;  %s1153_s7 = sshll.u32 (!%p1151_p3), %s1152_s23, 3 }
 0x144   : > { %s505_s24 = scalar_lea.vmem (!%p1151_p3), %s312_s21, %s1153_s7 [#allocation3] }
 0x148   : > { %v1669_v23 = vmov 0.0   ;;  %vm1670_vm2 = vmmov 0   ;;  %v506_v24 = vld [vmem:[%s505_s24] sm:$0xff] }
 0x149   : > { %1225 = vmatprep.subr.mxu0 %v1669_v23  ;;  %1233 = vmatprep.mubr.msk.f32.mxu0 %vm1670_vm2, %v1669_v23 }
 0x14a   : > { %1226 = vmatpush3.msra.mxu0 %v1922_v1 }
 0x14b   : > { %1227 = vmatprep.subr.mxu0 %v1669_v23 }
 0x14c   : > { %1228 = vmatpush3.msra.mxu0 %v1924_v2 }
 0x14d   : > { %1229 = vmatprep.subr.mxu0 %v1669_v23 }
 0x14e   : > { %1230 = vmatpush3.msra.mxu0 %v1931_v3 }
 0x14f   : > { %1231 = vmatprep.subr.mxu0 %v1669_v23 }
 0x150   : > { %1232 = vmatpush3.msra.mxu0 %v1941_v4 }
 0x151   : > { %1234 = vmatmul.mubr.msk.f32.vlgmr.msra.gmra.mxu0 %vm387_vm1, %v506_v24 }
 0x211   : > { %v576_v25 = vpop.f32.mrf.mxu0 }
 0x212   : > { %v577_v26 = vadd.f32 %v1974_v9, %v576_v25 }
 0x213   : > { %v1235_v27 = vpop.f32.mrf.mxu0 }
 0x214   : > { %v580_v28 = vmax.f32 %v577_v26, 0.0 }
 0x216   : > { %581 = vst.msk [vmem:[#allocation2 + $0x1] sm:$0xff] %vm387_vm1, %v580_v28 }
 0x217 PF: > { %p1155_p7 = scmp.ne.s32.totalorder %s1641_s30, 1 }
 0x219   : > { %585 = sbr.rel (%p1155_p7) target bundleno = 544 (0x220), region = 76 }
 0x21e   : > { %v1671_v29 = vmov 0.0  }
 0x21f   : > { %587 = vst.msk [vmem:[#allocation2 + $0x51] sm:$0xff] %vm387_vm1, %v1671_v29 }
 0x220 PF: > { %p1156_p9 = scmp.ge.s32.totalorder %s1641_s30, 1 }
 0x222   : > { %591 = sbr.rel (%p1156_p9) target bundleno = 758 (0x2f6), region = 80 }
 0x227   : > { %v1672_v30 = vmov 0.0   ;;  %vm1673_vm3 = vmmov 0   ;;  %v1159_v31 = vld [vmem:[%s1937_s19 + $0x20] sm:$0xff] }
 0x228   : > { %1236 = vmatprep.subr.mxu0 %v1672_v30  ;;  %1244 = vmatprep.mubr.msk.f32.mxu0 %vm1673_vm3, %v1672_v30 }
 0x229   : > { %1237 = vmatpush3.msra.mxu0 %v1922_v1 }
 0x22a   : > { %1238 = vmatprep.subr.mxu0 %v1672_v30 }
 0x22b   : > { %1239 = vmatpush3.msra.mxu0 %v1924_v2 }
 0x22c   : > { %1240 = vmatprep.subr.mxu0 %v1672_v30 }
 0x22d   : > { %1241 = vmatpush3.msra.mxu0 %v1931_v3 }
 0x22e   : > { %1242 = vmatprep.subr.mxu0 %v1672_v30 }
 0x22f   : > { %1243 = vmatpush3.msra.mxu0 %v1941_v4 }
 0x230   : > { %1245 = vmatmul.mubr.msk.f32.vlgmr.msra.gmra.mxu0 %vm387_vm1, %v1159_v31 }
 0x2f0   : > { %v665_v32 = vpop.f32.mrf.mxu0 }
 0x2f1   : > { %v666_v33 = vadd.f32 %v1974_v9, %v665_v32 }
 0x2f2   : > { %v1246_v34 = vpop.f32.mrf.mxu0 }
 0x2f3   : > { %v669_v35 = vmax.f32 %v666_v33, 0.0 }
 0x2f5   : > { %671 = vst.msk [vmem:[#allocation2 + $0x51] sm:$0xff] %vm387_vm1, %v669_v35 }
 0x2f6 PF: > { %v870_v36 = vld [vmem:[#allocation9 + $0x18] sm:$0xff]  ;;  %v869_v37 = vld [vmem:[#allocation9 + $0x10] sm:$0xff]  ;;  %v868_v38 = vld [vmem:[#allocation9 + $0x8] sm:$0xff]  ;;  %s2197_s5 = sld [smem:[#allocation25_spill]]  ;;  %s1003_s19 = sshll.u32 %s1985_s22, 4  ;;  %s2081_s19 = int_to_ptr.vmem [resolvable:$true] %s1003_s19 }
 0x2f7   : > { %1247 = vmatprep.subr.mxu0 %v870_v36  ;;  %1269 = vmatprep.subr.mxu1 %v870_v36  ;;  %v672_v39 = vld [vmem:[#allocation2] sm:$0xff]  ;;  %v731_v47 = vld [vmem:[#allocation2 + $0x10] sm:$0xff]  ;;  %v2033_v12 = vld [vmem:[#allocation8 + $0x8] ss:$0 sm:$0xff]  ;;  %s2198_s9 = sld [smem:[#allocation17_spill]]  ;;  %s2089_s23 = scalar_lea.sflag [#allocation5], %s352_s4 }
 0x2f8   : > { %v2012_v40 = vld [vmem:[#allocation8] ss:$0 sm:$0xff]  ;;  %1248 = vmatpush3.msra.mxu0 %v870_v36  ;;  %1273 = vmatpush3.msra.mxu1 %v870_v36  ;;  %v691_v42 = vld [vmem:[#allocation2 + $0x1] sm:$0xff]  ;;  %v867_v49 = vld [vmem:[#allocation9] sm:$0xff]  ;;  %s2199_s17 = sld [smem:[#allocation27_spill]]  ;;  %s1529_s7 = scalar_lea.vmem %s2081_s19, 512 }
 0x2f9   : > { %v683_v41 = vmul.f32 %v2012_v40, %v672_v39  ;;  %v2015_v43 = vld [vmem:[#allocation8 + $0x1] ss:$0 sm:$0xff]  ;;  %v711_v44 = vld [vmem:[#allocation2 + $0x2] sm:$0xff]  ;;  %1249 = vmatprep.subr.mxu0 %v869_v37  ;;  %1270 = vmatprep.subr.mxu1 %v869_v37  ;;  %v751_v51 = vld [vmem:[#allocation2 + $0x11] sm:$0xff]  ;;  %v684_v60 = vmul.f32 %v2012_v40, %v731_v47  ;;  %s2200_s14 = sld [smem:[#allocation19_spill]]  ;;  %p1530_p11 = scmp.ne.s32.totalorder %s2081_s19, %s1529_s7 }
 0x2fa   : > { %v703_v45 = vmul.f32 %v2015_v43, %v691_v42  ;;  %v1163_v46 = vld [vmem:[#allocation8 + $0x2] ss:$0 sm:$0xff]  ;;  %v2018_v48 = vld [vmem:[#allocation8 + $0x3] ss:$0 sm:$0xff]  ;;  %1250 = vmatpush3.msra.mxu0 %v869_v37  ;;  %1274 = vmatpush3.msra.mxu1 %v869_v37  ;;  %v2020_v52 = vld [vmem:[#allocation8 + $0x4] ss:$0 sm:$0xff]  ;;  %v704_v61 = vmul.f32 %v2015_v43, %v751_v51 }
 0x2fb   : > { %v723_v50 = vmul.f32 %v1163_v46, %v711_v44  ;;  %1251 = vmatprep.subr.mxu0 %v868_v38  ;;  %1271 = vmatprep.subr.mxu1 %v868_v38  ;;  %v743_v54 = vmul.f32 %v2018_v48, %v731_v47  ;;  %v792_v55 = vld [vmem:[#allocation2 + $0x20] sm:$0xff]  ;;  %v763_v63 = vmul.f32 %v2020_v52, %v751_v51  ;;  %v771_v2 = vld [vmem:[#allocation2 + $0x12] sm:$0xff]  ;;  %s2201_s18 = sld [smem:[#allocation28_spill]]  ;;  %s1674_s24 = smov [#allocation11]  }
 0x2fc   : > { %v707_v53 = vadd.f32 %v703_v45, %v683_v41  ;;  %1252 = vmatpush3.msra.mxu0 %v868_v38  ;;  %1275 = vmatpush3.msra.mxu1 %v868_v38  ;;  %v2023_v56 = vld [vmem:[#allocation8 + $0x5] ss:$0 sm:$0xff]  ;;  %v685_v59 = vmul.f32 %v2012_v40, %v792_v55  ;;  %v2029_v0 = vld [vmem:[#allocation8 + $0x6] ss:$0 sm:$0xff]  ;;  %v733_v4 = vld [vmem:[#allocation2 + $0x30] sm:$0xff]  ;;  %v708_v18 = vadd.f32 %v704_v61, %v684_v60  ;;  %s1533_s15 = sshll.u32 %s1674_s24, 4  ;;  %s1534_s15 = int_to_ptr.vmem [resolvable:$false] %s1533_s15 }
 0x2fd   : > { %v812_v57 = vld [vmem:[#allocation2 + $0x21] sm:$0xff]  ;;  %1253 = vmatprep.subr.mxu0 %v867_v49  ;;  %1272 = vmatprep.subr.mxu1 %v867_v49  ;;  %v783_v10 = vmul.f32 %v2023_v56, %v771_v2  ;;  %v745_v14 = vmul.f32 %v2018_v48, %v733_v4  ;;  %v753_v15 = vld [vmem:[#allocation2 + $0x31] sm:$0xff]  ;;  %v804_v16 = vmul.f32 %v2029_v0, %v792_v55  ;;  %s1178_s13 = sshll.u32 %s2198_s9, 3  ;;  %s1535_s20 = scalar_lea.vmem %s1534_s15, 1024 }
 0x2fe   : > { %v832_v58 = vld [vmem:[#allocation2 + $0x22] sm:$0xff]  ;;  %v727_v62 = vadd.f32 %v723_v50, %v707_v53  ;;  %v705_v1 = vmul.f32 %v2015_v43, %v812_v57  ;;  %1254 = vmatpush3.msra.mxu0 %v867_v49  ;;  %1276 = vmatpush3.msra.mxu1 %v867_v49  ;;  %v765_v17 = vmul.f32 %v2020_v52, %v753_v15  ;;  %v773_v21 = vld [vmem:[#allocation2 + $0x32] sm:$0xff]  ;;  %s1000_s21 = sadd.s32 %s1178_s13, %s1143_s6  ;;  %p1536_p0 = scmp.lt.s32.totalorder %s2081_s19, %s1534_s15 }
 0x2ff   : > { %v725_v3 = vmul.f32 %v1163_v46, %v832_v58  ;;  %v1168_v11 = vld [vmem:[#allocation8 + $0x7] ss:$0 sm:$0xff]  ;;  %v724_v22 = vmul.f32 %v1163_v46, %v771_v2  ;;  %v744_v23 = vmul.f32 %v2018_v48, %v792_v55  ;;  %v844_v25 = vmul.f32 %v2033_v12, %v832_v58  ;;  %s1179_s16 = sshll.u32 %s1000_s21, 7  ;;  %p2202_p6 = scmp.ne.s32.totalorder %s2200_s14, 0 }
 0x300   : > { %v747_v9 = vadd.f32 %v743_v54, %v727_v62  ;;  %v709_v13 = vadd.f32 %v705_v1, %v685_v59  ;;  %v824_v24 = vmul.f32 %v1168_v11, %v812_v57  ;;  %v785_v26 = vmul.f32 %v2023_v56, %v773_v21  ;;  %v794_v29 = vld [vmem:[#allocation2 + $0x40] sm:$0xff]  ;;  %p1537_p2 = scmp.lt.s32.totalorder %s1535_s20, %s1529_s7 }
 0x301   : > { %v728_v30 = vadd.f32 %v724_v22, %v708_v18  ;;  %v764_v31 = vmul.f32 %v2020_v52, %v812_v57  ;;  %v806_v32 = vmul.f32 %v2029_v0, %v794_v29  ;;  %v686_v33 = vmul.f32 %v2012_v40, %v733_v4  ;;  %v814_v38 = vld [vmem:[#allocation2 + $0x41] sm:$0xff]  ;;  %v1170_v40 = vld [vmem:[%s2197_s5] ss:$0 sm:$0xff]  ;;  %s2079_s12 = scalar_lea.hbm %s2201_s18, %s1179_s16  ;;  %p1531_p13 = pnand %p1530_p11, %p2202_p6 }
 0x302   : > { %v767_v19 = vadd.f32 %v763_v63, %v747_v9  ;;  %v729_v20 = vadd.f32 %v725_v3, %v709_v13  ;;  %v706_v34 = vmul.f32 %v2015_v43, %v753_v15  ;;  %v726_v35 = vmul.f32 %v1163_v46, %v773_v21  ;;  %v834_v50 = vld [vmem:[#allocation2 + $0x42] sm:$0xff]  ;;  %v815_v3 = vld [vmem:[#allocation2 + $0x51] sm:$0xff]  ;;  %p1538_p4 = por %p1537_p2, %p1536_p0 }
 0x303   : > { %v748_v39 = vadd.f32 %v744_v23, %v728_v30  ;;  %v784_v41 = vmul.f32 %v2023_v56, %v832_v58  ;;  %v826_v42 = vmul.f32 %v1168_v11, %v814_v38  ;;  %v746_v45 = vmul.f32 %v2018_v48, %v794_v29  ;;  %v795_v48 = vld [vmem:[#allocation2 + $0x50] sm:$0xff]  ;;  %p1532_p12 = pneg %p1531_p13 }
 0x304   : > { %v787_v27 = vadd.f32 %v783_v10, %v767_v19  ;;  %v749_v28 = vadd.f32 %v745_v14, %v729_v20  ;;  %v710_v44 = vadd.f32 %v706_v34, %v686_v33  ;;  %v805_v53 = vmul.f32 %v2029_v0, %v733_v4  ;;  %v835_v14 = vld [vmem:[#allocation2 + $0x52] sm:$0xff] }
 0x305   : > { %v768_v51 = vadd.f32 %v764_v31, %v748_v39  ;;  %v846_v43 = vmul.f32 %v2033_v12, %v834_v50  ;;  %v766_v54 = vmul.f32 %v2020_v52, %v814_v38  ;;  %v825_v59 = vmul.f32 %v1168_v11, %v753_v15  ;;  %p1539_p5 = pnand %p1538_p4, %p1532_p12 }
 0x306   : > { %v808_v36 = vadd.f32 %v804_v16, %v787_v27  ;;  %v769_v37 = vadd.f32 %v765_v17, %v749_v28  ;;  %v730_v46 = vadd.f32 %v726_v35, %v710_v44  ;;  %v786_v61 = vmul.f32 %v2023_v56, %v834_v50 }
 0x307   : > { %v788_v58 = vadd.f32 %v784_v41, %v768_v51  ;;  %v845_v2 = vmul.f32 %v2033_v12, %v773_v21  ;;  %v807_v9 = vmul.f32 %v2029_v0, %v795_v48  ;;  %v827_v17 = vmul.f32 %v1168_v11, %v815_v3 }
 0x308   : > { %v828_v47 = vadd.f32 %v824_v24, %v808_v36  ;;  %v789_v49 = vadd.f32 %v785_v26, %v769_v37  ;;  %v750_v60 = vadd.f32 %v746_v45, %v730_v46  ;;  %v847_v19 = vmul.f32 %v2033_v12, %v835_v14 }
 0x309   : > { %v809_v1 = vadd.f32 %v805_v53, %v788_v58 }
 0x30a   : > { %v848_v55 = vadd.f32 %v844_v25, %v828_v47  ;;  %v810_v57 = vadd.f32 %v806_v32, %v789_v49  ;;  %v770_v4 = vadd.f32 %v766_v54, %v750_v60  ;;  %v1171_v25 = vld [vmem:[%s2199_s17] ss:$0 sm:$0xff] }
 0x30b   : > { %v829_v52 = vadd.f32 %v825_v59, %v809_v1 }
 0x30c   : > { %v859_v62 = vadd.f32 %v1170_v40, %v848_v55  ;;  %v830_v63 = vadd.f32 %v826_v42, %v810_v57  ;;  %v790_v16 = vadd.f32 %v786_v61, %v770_v4 }
 0x30d   : > { %v849_v18 = vadd.f32 %v845_v2, %v829_v52 }
 0x30e   : > { %v863_v10 = vmax.f32 %v859_v62, 0.0  ;;  %v850_v13 = vadd.f32 %v846_v43, %v830_v63  ;;  %v811_v56 = vadd.f32 %v807_v9, %v790_v16 }
 0x30f   : > { %v860_v21 = vadd.f32 %v1170_v40, %v849_v18 }
 0x310   : > { %1255 = vmatprep.mubr.msk.f32.mxu0 %vm387_vm1, %v863_v10  ;;  %v861_v15 = vadd.f32 %v1170_v40, %v850_v13  ;;  %v831_v22 = vadd.f32 %v827_v17, %v811_v56 }
 0x311   : > { %v864_v0 = vmax.f32 %v860_v21, 0.0 }
 0x312   : > { %v865_v20 = vmax.f32 %v861_v15, 0.0  ;;  %v851_v23 = vadd.f32 %v847_v19, %v831_v22 }
 0x313   : > { %1256 = vmatmul.mubr.msk.f32.vlgmr.msra.gmra.mxu0 %vm387_vm1, %v864_v0 }
 0x314   : > { %1258 = vmatprep.mubr.msk.f32.mxu1 %vm387_vm1, %v865_v20  ;;  %v862_v11 = vadd.f32 %v1170_v40, %v851_v23 }
 0x316   : > { %v866_v24 = vmax.f32 %v862_v11, 0.0 }
 0x318   : > { %1259 = vmatmul.mubr.msk.f32.vlgmr.msra.gmra.mxu1 %vm387_vm1, %v866_v24 }
 0x3d3   : > { %v1257_v12 = vpop.f32.mrf.mxu0 }
 0x3d4   : > { %v962_v26 = vadd.f32 %v1257_v12, %v1171_v25 }
 0x3d5   : > { %v956_v27 = vpop.f32.mrf.mxu0 }
 0x3d6   : > { %v976_v28 = vadd.f32 %v962_v26, %v1956_v7  ;;  %v957_v29 = vadd.f32 %v1171_v25, %v956_v27 }
 0x3d8   : > { %v980_v30 = vmax.f32 %v976_v28, 0.0  ;;  %v1260_v31 = vpop.f32.mrf.mxu1  ;;  %v975_v32 = vadd.f32 %v957_v29, %v1948_v5 }
 0x3d9   : > { %v972_v33 = vadd.f32 %v1260_v31, %v1171_v25 }
 0x3da   : > { %984 = vst.msk [vmem:[%s1985_s22 + $0x8] sm:$0xff] %vm387_vm1, %v980_v30  ;;  %v979_v34 = vmax.f32 %v975_v32, 0.0  ;;  %v966_v35 = vpop.f32.mrf.mxu1 }
 0x3db   : > { %v978_v36 = vadd.f32 %v972_v33, %v1959_v8  ;;  %v967_v37 = vadd.f32 %v1171_v25, %v966_v35 }
 0x3dc   : > { %983 = vst.msk [vmem:[%s1985_s22] sm:$0xff] %vm387_vm1, %v979_v34 }
 0x3dd   : > { %v982_v7 = vmax.f32 %v978_v36, 0.0  ;;  %v977_v5 = vadd.f32 %v967_v37, %v1951_v6 }
 0x3df   : > { %986 = vst.msk [vmem:[%s1985_s22 + $0x18] sm:$0xff] %vm387_vm1, %v982_v7  ;;  %v981_v8 = vmax.f32 %v977_v5, 0.0 }
 0x3e1   : > { %985 = vst.msk [vmem:[%s1985_s22 + $0x10] sm:$0xff] %vm387_vm1, %v981_v8 }
 0x3e2   : > { %1542 = shalt.err (!%p1539_p5)
}
 0x3e3   : > { %s1543_s4 = scalar_lea.hbm %s2079_s12, 512  ;;  %s1547_s9 = scalar_lea.hbm %s2201_s18, 2048 }
 0x3e4   : > { %p1544_p8 = scmp.ne.s32.totalorder %s2079_s12, %s1543_s4  ;;  %p1548_p3 = scmp.lt.s32.totalorder %s2079_s12, %s2201_s18 }
 0x3e5   : > { %p1549_p7 = scmp.lt.s32.totalorder %s1547_s9, %s1543_s4 }
 0x3e6   : > { %p1545_p10 = pnand %p1544_p8, %p2202_p6 }
 0x3e7   : > { %p1550_p9 = por %p1549_p7, %p1548_p3 }
 0x3e8   : > { %p1546_p1 = pneg %p1545_p10 }
 0x3ea   : > { %p1551_p11 = pnand %p1550_p9, %p1546_p1 }
 0x3ec   : > { %1554 = shalt.err (!%p1551_p11)
}
 0x3ed   : > { %s1675_s17 = smov 128   ;;  %s1676_s13 = smov 8  }
 0x3ee   : > { %1291 = dma.vmem_to_hbm [thread:$0]  (%p2202_p6), %s2081_s19, 512, %s2079_s12, %s2089_s23, %s1675_s17, %s1675_s17, %s1676_s13  }
 0x3ef PF: > { %s2203_s21 = sld [smem:[#allocation16_spill]]  ;;  %p1318_p13 = scmp.ge.s32.totalorder %s1657_s11, 2 }
 0x3f0   : > { %s2204_s16 = sld [smem:[#allocation20_spill]] }
 0x3f5   : > { %s1018_s30 = sand.u32 1, %s2203_s21  }
 0x3f6   : > { %p2205_p12 = scmp.ne.s32.totalorder %s2204_s16, 0  ;;  %s1019_s6 = scalar_lea.sflag [#allocation5], %s1018_s30 }
 0x3f8   : > { %p1308_p0 = pnand %p1318_p13, %p2205_p12 }
 0x3fa   : > { %p1309_p2 = pneg %p1308_p0 }
 0x3fc   : > { %1612 = dma.done.wait (%p1309_p2), %s1019_s6, 512  }
 0x3fd   : > { %1614 = vsyncadd (%p1309_p2), %s1019_s6, 4294966784  ;;  %s25_s11 = sadd.s32 1, %s1657_s11   ;;  %s2206_s30 = sld [smem:[#allocation18_spill]] }
 0x3fe   : > { %p22_p4 = scmp.ge.s32.totalorder %s25_s11, 6   ;;  %s2207_s9 = sld [smem:[#allocation21_spill]] }
 0x3ff   : > { %s2208_s14 = sld [smem:[#allocation22_spill]]  ;;  %s2209_s24 = smov %s1621_s25 }
 0x400   : > { %s2210_s25 = smov %s1625_s26  ;;  %s2211_s26 = smov %s1878_s27 }
 0x401   : > { %s2212_s27 = smov %s1633_s28  ;;  %s2213_s28 = smov %s1637_s29 }
 0x402   : > { %s2214_s29 = smov %s1873_s3  ;;  %s2215_s8 = smov %s1653_s10 }
 0x403   :  { %24 = sbr.rel (!%p22_p4) target bundleno = 18 (0x12), region = 136 }
 0x405   : > { %s2216_s10 = smov %s2208_s14 }
 0x408   :  { %1024 = vsyncpa [#allocation4], 1 }
 0x409   :  { %1026 = vsyncpa [#allocation4 + $0x1], 1 }
 0x40a   :  { %1027 = vsyncpa [#allocation7], 1 }
 0x40b   :  { %1028 = vsyncpa [#allocation10], 1 }
 0x40c   :  { %1029 = vsyncpa [#allocation5], 1 }
 0x40d   :  { %1031 = vsyncpa [#allocation5 + $0x1], 1 }

</bundles_post_ra>
